<compile_context>
chip_gen: v5e
topology: v5e:2x2
jax: 0.10.0
libtpu: 0.0.40
codegen_flags: <defaults>
</compile_context>

<pallas_src>
import jax
import jax.numpy as jnp
from jax.experimental import pallas as pl
from jax.experimental.pallas import tpu as pltpu

LN_EPS = 1e-5  # torch.nn.LayerNorm default eps


# ----------------------------- kernel --------------------------------------- #

def _ucmodel_fused_kernel(x_ref, w1_ref, wf_ref, w2_ref, vecs_ref, b2_ref,
                          out_ref):
    bf16, f32 = jnp.bfloat16, jnp.float32

    b1   = vecs_ref[0:1, :]
    ln_g = vecs_ref[1:2, :]
    ln_b = vecs_ref[2:3, :]
    b_f  = vecs_ref[3:4, :]

    # fc1 + ReLU (bf16 MXU operands, f32 accumulation)
    x = x_ref[...].astype(bf16)
    h1 = jnp.dot(x, w1_ref[...], preferred_element_type=f32) + b1
    h1 = jnp.maximum(h1, 0.0)

    # LayerNorm over features (biased variance, eps=1e-5, affine) -- f32
    mean = jnp.mean(h1, axis=-1, keepdims=True)
    cent = h1 - mean
    var = jnp.mean(cent * cent, axis=-1, keepdims=True)
    ln = cent * jax.lax.rsqrt(var + LN_EPS) * ln_g + ln_b

    # Folded (degenerate attention + residual + relational) matmul + tanh
    hp = jnp.tanh(jnp.dot(ln.astype(bf16), wf_ref[...],
                          preferred_element_type=f32) + b_f)

    # --- threshold = torch.quantile(|hp|, 0.5), exact, in-kernel -------------
    # |hp| >= 0, so its f32 bit pattern (viewed as int32) is monotone in the
    # value.  Binary-search the smallest m' with count(bits < m') >= rank;
    # m' - 1 is then exactly the bit pattern of the rank-th smallest element.
    habs = jnp.abs(hp)
    hbits = pltpu.bitcast(habs, jnp.int32)

    n = habs.size                          # static
    pos = 0.5 * (n - 1)                    # torch/np "linear" interpolation
    rank = int(pos) + 1                    # 1-based rank of lower neighbor
    frac = pos - int(pos)                  # static python float

    def body(_, carry):
        lo, hi = carry                     # (1,1) int32; cnt(<lo) < rank <= cnt(<hi)
        mid = (lo + hi) >> 1
        cnt = jnp.sum((hbits < mid).astype(jnp.int32), keepdims=True)
        take_hi = cnt >= rank
        return (jnp.where(take_hi, lo, mid), jnp.where(take_hi, mid, hi))

    lo0 = jnp.full((1, 1), 0, jnp.int32)            # cnt(< 0) == 0
    hi0 = jnp.full((1, 1), 0x3F800001, jnp.int32)   # bits(1.0f)+1; |tanh| <= 1
    _, hi = jax.lax.fori_loop(0, 31, body, (lo0, hi0))
    kbits = hi - 1                                  # bits of rank-th smallest

    v_lo = jnp.max(jnp.where(hbits <= kbits, habs, -jnp.inf), keepdims=True)
    if frac > 0.0:
        cnt_le = jnp.sum((habs <= v_lo).astype(jnp.int32), keepdims=True)
        v_gt = jnp.min(jnp.where(habs > v_lo, habs, jnp.inf), keepdims=True)
        v_hi = jnp.where(cnt_le >= rank + 1, v_lo, v_gt)   # handles ties
        thr = v_lo + frac * (v_hi - v_lo)
    else:
        thr = v_lo

    # Soft-threshold collapse + fc2 (lane-dense, 128-padded output)
    collapsed = jnp.maximum(hp - thr, 0.0) - jnp.maximum(-hp - thr, 0.0)
    out_ref[...] = (jnp.dot(collapsed.astype(bf16), w2_ref[...],
                            preferred_element_type=f32) + b2_ref[...])


# ----------------------------- wrapper -------------------------------------- #

def ucmodel_forward(x, params):
    f32, bf16 = jnp.float32, jnp.bfloat16
    B = x.shape[0]
    H = params["w1"].shape[1]
    out_dim = params["w2"].shape[1]
    out_pad = ((out_dim + 127) // 128) * 128

    # Fold seq-len-1 attention (softmax over one key == 1 -> out_proj(V_proj))
    # + residual + relational linear into a single weight/bias (exact algebra).
    wf = (jnp.eye(H, dtype=f32) + params["wv"] @ params["wo"]) @ params["wr"]
    b_f = (params["bv"] @ params["wo"] + params["bo"]) @ params["wr"] + params["br"]

    # Pack the four (1, H) row vectors into one (8, H) tile.
    vecs = jnp.zeros((8, H), f32)
    vecs = vecs.at[0].set(params["b1"][0])
    vecs = vecs.at[1].set(params["ln_g"][0])
    vecs = vecs.at[2].set(params["ln_b"][0])
    vecs = vecs.at[3].set(b_f[0])

    # Pad fc2 to a lane-dense (multiple-of-128) output width; slice outside.
    w2p = jnp.zeros((H, out_pad), f32).at[:, :out_dim].set(params["w2"]).astype(bf16)
    b2p = jnp.zeros((1, out_pad), f32).at[:, :out_dim].set(params["b2"])

    vmem = pl.BlockSpec(memory_space=pltpu.MemorySpace.VMEM)
    out = pl.pallas_call(
        _ucmodel_fused_kernel,
        out_shape=jax.ShapeDtypeStruct((B, out_pad), f32),
        in_specs=[vmem] * 6,
        out_specs=vmem,
    )(x, params["w1"].astype(bf16), wf.astype(bf16), w2p, vecs, b2p)
    return out[:, :out_dim]


# ----------------------------- references ----------------------------------- #

def ucmodel_reference_f32(x, p):
    """Faithful f32 reference of the PyTorch forward."""
    h1 = jnp.maximum(x @ p["w1"] + p["b1"], 0.0)
    mean = h1.mean(-1, keepdims=True)
    var = ((h1 - mean) ** 2).mean(-1, keepdims=True)
    ln = (h1 - mean) * jax.lax.rsqrt(var + LN_EPS) * p["ln_g"] + p["ln_b"]
    v = ln @ p["wv"] + p["bv"]
    h_att = v @ p["wo"] + p["bo"]
    h = ln + h_att
    hp = jnp.tanh(h @ p["wr"] + p["br"])
    t = jnp.quantile(jnp.abs(hp), 0.5)
    c = jnp.maximum(hp - t, 0.0) - jnp.maximum(-hp - t, 0.0)
    return c @ p["w2"] + p["b2"]


def ucmodel_reference_bf16(x, p):
    """Structural reference with the kernel's folded weights + bf16 matmul
    operands (f32 accumulation) -- validates the kernel logic tightly."""
    f32, bf16 = jnp.float32, jnp.bfloat16
    mm = lambda a, w: jnp.dot(a.astype(bf16), w.astype(bf16),
                              preferred_element_type=f32)
    h1 = jnp.maximum(mm(x, p["w1"]) + p["b1"], 0.0)
    mean = h1.mean(-1, keepdims=True)
    var = ((h1 - mean) ** 2).mean(-1, keepdims=True)
    ln = (h1 - mean) * jax.lax.rsqrt(var + LN_EPS) * p["ln_g"] + p["ln_b"]
    H = p["w1"].shape[1]
    wf = (jnp.eye(H, dtype=f32) + p["wv"] @ p["wo"]) @ p["wr"]
    b_f = (p["bv"] @ p["wo"] + p["bo"]) @ p["wr"] + p["br"]
    hp = jnp.tanh(mm(ln, wf) + b_f)
    t = jnp.quantile(jnp.abs(hp), 0.5)
    c = jnp.maximum(hp - t, 0.0) - jnp.maximum(-hp - t, 0.0)
    return mm(c, p["w2"]) + p["b2"]


# ----------------------------- params --------------------------------------- #

def init_params(key, input_dim, hidden_dim, output_dim):
    ks = jax.random.split(key, 12)
    f32 = jnp.float32

    def kaiming(k, fan_in, fan_out):  # kaiming_normal_ (fan_in mode, relu gain)
        return (jax.random.normal(k, (fan_in, fan_out), f32)
                * jnp.sqrt(2.0 / fan_in))

    def xavier(k, fan_in, fan_out):
        lim = jnp.sqrt(6.0 / (fan_in + fan_out))
        return jax.random.uniform(k, (fan_in, fan_out), f32, -lim, lim)

    def bias(k, fan_in, n):
        lim = 1.0 / jnp.sqrt(fan_in)
        return jax.random.uniform(k, (1, n), f32, -lim, lim)

    return {
        # fc1
        "w1": kaiming(ks[0], input_dim, hidden_dim),
        "b1": bias(ks[1], input_dim, hidden_dim),
        # LayerNorm
        "ln_g": jnp.ones((1, hidden_dim), f32),
        "ln_b": jnp.zeros((1, hidden_dim), f32),
        # MHA: V slice of in_proj (xavier_uniform, zero bias) + out_proj
        "wv": xavier(ks[2], hidden_dim, hidden_dim),
        "bv": jnp.zeros((1, hidden_dim), f32),
        "wo": xavier(ks[3], hidden_dim, hidden_dim),
        "bo": jnp.zeros((1, hidden_dim), f32),
        # relational
        "wr": kaiming(ks[4], hidden_dim, hidden_dim),
        "br": bias(ks[5], hidden_dim, hidden_dim),
        # fc2
        "w2": kaiming(ks[6], hidden_dim, output_dim),
        "b2": bias(ks[7], hidden_dim, output_dim),
    }


# ----------------------------- main ------------------------------------------ #

if __name__ == "__main__":
    # Small shapes consistent with the module (hidden divisible by 8 heads).
    B, INPUT_DIM, HIDDEN_DIM, OUTPUT_DIM = 8, 64, 128, 16

    key = jax.random.PRNGKey(0)
    k_x, k_p = jax.random.split(key)
    x = jax.random.normal(k_x, (B, INPUT_DIM), jnp.float32)
    params = init_params(k_p, INPUT_DIM, HIDDEN_DIM, OUTPUT_DIM)

    out = jax.block_until_ready(ucmodel_forward(x, params))
    assert out.shape == (B, OUTPUT_DIM), out.shape
    assert bool(jnp.all(jnp.isfinite(out)))

    # Tight check vs. a reference with the same folded-weight / bf16-matmul
    # structure (isolates kernel correctness from intentional bf16 rounding).
    ref_tight = ucmodel_reference_bf16(x, params)
    assert bool(jnp.allclose(out, ref_tight, rtol=1e-3, atol=1e-3)), (
        float(jnp.max(jnp.abs(out - ref_tight))))

    # Loose check vs. the exact f32 PyTorch-equivalent forward; the gap is the
    # intentional bf16 quantization of the MXU operands.
    ref_f32 = ucmodel_reference_f32(x, params)
    assert bool(jnp.allclose(out, ref_f32, rtol=5e-2, atol=5e-2)), (
        float(jnp.max(jnp.abs(out - ref_f32))))

    print("KERNEL_OK")
</pallas_src>

<mosaic_0001>
module attributes {stable_mosaic.version = 11 : i64} {
  func.func @_ucmodel_fused_kernel(%arg0: memref<8x64xf32, #tpu.memory_space<vmem>>, %arg1: memref<64x128xbf16, #tpu.memory_space<vmem>>, %arg2: memref<128x128xbf16, #tpu.memory_space<vmem>>, %arg3: memref<128x128xbf16, #tpu.memory_space<vmem>>, %arg4: memref<8x128xf32, #tpu.memory_space<vmem>>, %arg5: memref<1x128xf32, #tpu.memory_space<vmem>>, %arg6: memref<8x128xf32, #tpu.memory_space<vmem>>) attributes {dimension_semantics = [], scalar_prefetch = 0 : i64, scratch_operands = 0 : i64, tpu.core_type = #tpu.core_type<tc>} {
    %c0 = arith.constant 0 : index
    %c0_0 = arith.constant 0 : index
    %0 = vector.load %arg4[%c0, %c0_0] : memref<8x128xf32, #tpu.memory_space<vmem>>, vector<1x128xf32>
    %c1 = arith.constant 1 : index
    %c0_1 = arith.constant 0 : index
    %1 = vector.load %arg4[%c1, %c0_1] : memref<8x128xf32, #tpu.memory_space<vmem>>, vector<1x128xf32>
    %c2 = arith.constant 2 : index
    %c0_2 = arith.constant 0 : index
    %2 = vector.load %arg4[%c2, %c0_2] : memref<8x128xf32, #tpu.memory_space<vmem>>, vector<1x128xf32>
    %c3 = arith.constant 3 : index
    %c0_3 = arith.constant 0 : index
    %3 = vector.load %arg4[%c3, %c0_3] : memref<8x128xf32, #tpu.memory_space<vmem>>, vector<1x128xf32>
    %c0_4 = arith.constant 0 : index
    %c0_5 = arith.constant 0 : index
    %4 = vector.load %arg0[%c0_4, %c0_5] : memref<8x64xf32, #tpu.memory_space<vmem>>, vector<8x64xf32>
    %5 = arith.truncf %4 : vector<8x64xf32> to vector<8x64xbf16>
    %c0_6 = arith.constant 0 : index
    %c0_7 = arith.constant 0 : index
    %6 = vector.load %arg1[%c0_6, %c0_7] : memref<64x128xbf16, #tpu.memory_space<vmem>>, vector<64x128xbf16>
    %cst = arith.constant dense<0.000000e+00> : vector<8x128xf32>
    %7 = tpu.matmul %5, %6, %cst {dimension_numbers = #tpu.dot_dimension_numbers<[1], [0], [0], [1], [0, 0, 1, 1], [], []>} : vector<8x64xbf16>, vector<64x128xbf16>, vector<8x128xf32> -> vector<8x128xf32>
    %8 = vector.broadcast %0 : vector<1x128xf32> to vector<8x128xf32>
    %9 = arith.addf %7, %8 : vector<8x128xf32>
    %cst_8 = arith.constant 0.000000e+00 : f32
    %10 = vector.broadcast %cst_8 : f32 to vector<8x128xf32>
    %11 = arith.maximumf %9, %10 : vector<8x128xf32>
    %cst_9 = arith.constant dense<0.000000e+00> : vector<8xf32>
    %12 = vector.multi_reduction <add>, %11, %cst_9 [1] : vector<8x128xf32> to vector<8xf32>
    %13 = vector.shape_cast %12 : vector<8xf32> to vector<8x1xf32>
    %cst_10 = arith.constant 1.280000e+02 : f32
    %14 = vector.broadcast %cst_10 : f32 to vector<8x1xf32>
    %15 = arith.divf %13, %14 : vector<8x1xf32>
    %16 = vector.broadcast %15 : vector<8x1xf32> to vector<8x128xf32>
    %17 = arith.subf %11, %16 : vector<8x128xf32>
    %18 = arith.mulf %17, %17 : vector<8x128xf32>
    %cst_11 = arith.constant dense<0.000000e+00> : vector<8xf32>
    %19 = vector.multi_reduction <add>, %18, %cst_11 [1] : vector<8x128xf32> to vector<8xf32>
    %20 = vector.shape_cast %19 : vector<8xf32> to vector<8x1xf32>
    %cst_12 = arith.constant 1.280000e+02 : f32
    %21 = vector.broadcast %cst_12 : f32 to vector<8x1xf32>
    %22 = arith.divf %20, %21 : vector<8x1xf32>
    %cst_13 = arith.constant 9.99999974E-6 : f32
    %23 = vector.broadcast %cst_13 : f32 to vector<8x1xf32>
    %24 = arith.addf %22, %23 : vector<8x1xf32>
    %25 = math.rsqrt %24 : vector<8x1xf32>
    %26 = vector.broadcast %25 : vector<8x1xf32> to vector<8x128xf32>
    %27 = arith.mulf %17, %26 : vector<8x128xf32>
    %28 = vector.broadcast %1 : vector<1x128xf32> to vector<8x128xf32>
    %29 = arith.mulf %27, %28 : vector<8x128xf32>
    %30 = vector.broadcast %2 : vector<1x128xf32> to vector<8x128xf32>
    %31 = arith.addf %29, %30 : vector<8x128xf32>
    %32 = arith.truncf %31 : vector<8x128xf32> to vector<8x128xbf16>
    %c0_14 = arith.constant 0 : index
    %c0_15 = arith.constant 0 : index
    %33 = vector.load %arg2[%c0_14, %c0_15] : memref<128x128xbf16, #tpu.memory_space<vmem>>, vector<128x128xbf16>
    %cst_16 = arith.constant dense<0.000000e+00> : vector<8x128xf32>
    %34 = tpu.matmul %32, %33, %cst_16 {dimension_numbers = #tpu.dot_dimension_numbers<[1], [0], [0], [1], [0, 0, 1, 1], [], []>} : vector<8x128xbf16>, vector<128x128xbf16>, vector<8x128xf32> -> vector<8x128xf32>
    %35 = vector.broadcast %3 : vector<1x128xf32> to vector<8x128xf32>
    %36 = arith.addf %34, %35 : vector<8x128xf32>
    %37 = math.tanh %36 : vector<8x128xf32>
    %38 = math.absf %37 : vector<8x128xf32>
    %39 = tpu.bitcast %38 : vector<8x128xf32> -> vector<8x128xi32>
    %c0_i32 = arith.constant 0 : i32
    %40 = vector.broadcast %c0_i32 : i32 to vector<1x1xi32>
    %c1065353217_i32 = arith.constant 1065353217 : i32
    %41 = vector.broadcast %c1065353217_i32 : i32 to vector<1x1xi32>
    %c0_i32_17 = arith.constant 0 : i32
    %c31_i32 = arith.constant 31 : i32
    %42 = arith.addi %c0_i32_17, %c31_i32 : i32
    %c1_i32 = arith.constant 1 : i32
    %43:2 = scf.for %arg7 = %c0_i32_17 to %42 step %c1_i32 iter_args(%arg8 = %40, %arg9 = %41) -> (vector<1x1xi32>, vector<1x1xi32>)  : i32 {
      %97 = arith.addi %arg8, %arg9 : vector<1x1xi32>
      %c1_i32_35 = arith.constant 1 : i32
      %98 = vector.broadcast %c1_i32_35 : i32 to vector<1x1xi32>
      %99 = arith.shrsi %97, %98 : vector<1x1xi32>
      %100 = vector.broadcast %99 : vector<1x1xi32> to vector<8x128xi32>
      %101 = arith.cmpi slt, %39, %100 : vector<8x128xi32>
      %102 = arith.extui %101 : vector<8x128xi1> to vector<8x128xi32>
      %103 = vector.shape_cast %102 : vector<8x128xi32> to vector<1x8x128xi32>
      %cst_36 = arith.constant dense<0> : vector<1xi32>
      %104 = vector.multi_reduction <add>, %103, %cst_36 [1, 2] : vector<1x8x128xi32> to vector<1xi32>
      %105 = vector.shape_cast %104 : vector<1xi32> to vector<1x1x1xi32>
      %106 = vector.extract %105[0, 0, 0] : i32 from vector<1x1x1xi32>
      %107 = vector.broadcast %106 : i32 to vector<1x1xi32>
      %c512_i32 = arith.constant 512 : i32
      %108 = vector.broadcast %c512_i32 : i32 to vector<1x1xi32>
      %109 = arith.cmpi sge, %107, %108 : vector<1x1xi32>
      %110 = arith.select %109, %arg8, %99 : vector<1x1xi1>, vector<1x1xi32>
      %111 = arith.select %109, %99, %arg9 : vector<1x1xi1>, vector<1x1xi32>
      scf.yield %110, %111 : vector<1x1xi32>, vector<1x1xi32>
    }
    %c1_i32_18 = arith.constant 1 : i32
    %44 = vector.broadcast %c1_i32_18 : i32 to vector<1x1xi32>
    %45 = arith.subi %43#1, %44 : vector<1x1xi32>
    %46 = vector.broadcast %45 : vector<1x1xi32> to vector<8x128xi32>
    %47 = arith.cmpi sle, %39, %46 : vector<8x128xi32>
    %cst_19 = arith.constant 0xFF800000 : f32
    %48 = vector.broadcast %cst_19 : f32 to vector<8x128xf32>
    %49 = arith.select %47, %38, %48 : vector<8x128xi1>, vector<8x128xf32>
    %50 = vector.shape_cast %49 : vector<8x128xf32> to vector<1x8x128xf32>
    %cst_20 = arith.constant dense<0xFF800000> : vector<1xf32>
    %51 = vector.multi_reduction <maximumf>, %50, %cst_20 [1, 2] : vector<1x8x128xf32> to vector<1xf32>
    %52 = vector.shape_cast %51 : vector<1xf32> to vector<1x1x1xf32>
    %53 = vector.extract %52[0, 0, 0] : f32 from vector<1x1x1xf32>
    %54 = vector.broadcast %53 : f32 to vector<1x1xf32>
    %55 = vector.broadcast %54 : vector<1x1xf32> to vector<8x128xf32>
    %56 = arith.cmpf ole, %38, %55 : vector<8x128xf32>
    %57 = arith.extui %56 : vector<8x128xi1> to vector<8x128xi32>
    %58 = vector.shape_cast %57 : vector<8x128xi32> to vector<1x8x128xi32>
    %cst_21 = arith.constant dense<0> : vector<1xi32>
    %59 = vector.multi_reduction <add>, %58, %cst_21 [1, 2] : vector<1x8x128xi32> to vector<1xi32>
    %60 = vector.shape_cast %59 : vector<1xi32> to vector<1x1x1xi32>
    %61 = vector.extract %60[0, 0, 0] : i32 from vector<1x1x1xi32>
    %62 = vector.broadcast %61 : i32 to vector<1x1xi32>
    %63 = vector.broadcast %54 : vector<1x1xf32> to vector<8x128xf32>
    %64 = arith.cmpf ogt, %38, %63 : vector<8x128xf32>
    %cst_22 = arith.constant 0x7F800000 : f32
    %65 = vector.broadcast %cst_22 : f32 to vector<8x128xf32>
    %66 = arith.select %64, %38, %65 : vector<8x128xi1>, vector<8x128xf32>
    %67 = vector.shape_cast %66 : vector<8x128xf32> to vector<1x8x128xf32>
    %cst_23 = arith.constant dense<0x7F800000> : vector<1xf32>
    %68 = vector.multi_reduction <minimumf>, %67, %cst_23 [1, 2] : vector<1x8x128xf32> to vector<1xf32>
    %69 = vector.shape_cast %68 : vector<1xf32> to vector<1x1x1xf32>
    %70 = vector.extract %69[0, 0, 0] : f32 from vector<1x1x1xf32>
    %71 = vector.broadcast %70 : f32 to vector<1x1xf32>
    %c513_i32 = arith.constant 513 : i32
    %72 = vector.broadcast %c513_i32 : i32 to vector<1x1xi32>
    %73 = arith.cmpi sge, %62, %72 : vector<1x1xi32>
    %74 = arith.select %73, %54, %71 : vector<1x1xi1>, vector<1x1xf32>
    %75 = arith.subf %74, %54 : vector<1x1xf32>
    %cst_24 = arith.constant 5.000000e-01 : f32
    %76 = vector.broadcast %cst_24 : f32 to vector<1x1xf32>
    %77 = arith.mulf %76, %75 : vector<1x1xf32>
    %78 = arith.addf %54, %77 : vector<1x1xf32>
    %79 = vector.broadcast %78 : vector<1x1xf32> to vector<8x128xf32>
    %80 = arith.subf %37, %79 : vector<8x128xf32>
    %cst_25 = arith.constant 0.000000e+00 : f32
    %81 = vector.broadcast %cst_25 : f32 to vector<8x128xf32>
    %82 = arith.maximumf %80, %81 : vector<8x128xf32>
    %cst_26 = arith.constant 0.000000e+00 : f32
    %83 = vector.broadcast %cst_26 : f32 to vector<8x128xf32>
    %84 = arith.subf %83, %37 : vector<8x128xf32>
    %85 = vector.broadcast %78 : vector<1x1xf32> to vector<8x128xf32>
    %86 = arith.subf %84, %85 : vector<8x128xf32>
    %cst_27 = arith.constant 0.000000e+00 : f32
    %87 = vector.broadcast %cst_27 : f32 to vector<8x128xf32>
    %88 = arith.maximumf %86, %87 : vector<8x128xf32>
    %89 = arith.subf %82, %88 : vector<8x128xf32>
    %90 = arith.truncf %89 : vector<8x128xf32> to vector<8x128xbf16>
    %c0_28 = arith.constant 0 : index
    %c0_29 = arith.constant 0 : index
    %91 = vector.load %arg3[%c0_28, %c0_29] : memref<128x128xbf16, #tpu.memory_space<vmem>>, vector<128x128xbf16>
    %cst_30 = arith.constant dense<0.000000e+00> : vector<8x128xf32>
    %92 = tpu.matmul %90, %91, %cst_30 {dimension_numbers = #tpu.dot_dimension_numbers<[1], [0], [0], [1], [0, 0, 1, 1], [], []>} : vector<8x128xbf16>, vector<128x128xbf16>, vector<8x128xf32> -> vector<8x128xf32>
    %c0_31 = arith.constant 0 : index
    %c0_32 = arith.constant 0 : index
    %93 = vector.load %arg5[%c0_31, %c0_32] : memref<1x128xf32, #tpu.memory_space<vmem>>, vector<1x128xf32>
    %94 = vector.broadcast %93 : vector<1x128xf32> to vector<8x128xf32>
    %95 = arith.addf %92, %94 : vector<8x128xf32>
    %c0_33 = arith.constant 0 : index
    %c0_34 = arith.constant 0 : index
    %96 = vector.load %arg6[%c0_33, %c0_34] : memref<8x128xf32, #tpu.memory_space<vmem>>, vector<8x128xf32>
    tpu.vector_store %arg6[%c0_33, %c0_34], %95 {strides = array<i32>} : memref<8x128xf32, #tpu.memory_space<vmem>>, vector<8x128xf32>,
    return
  }
}

</mosaic_0001>

<bundles_post_ra>
// kernel: tpu_custom_call.1
= control target key start
LH: loop header
LB: loop body
LE: loop exit
PB: predicated region body
PF: predicated region fallthrough
CT: control target
= control target key end

     0   :  { %11 = vsyncpa [#allocation3], 0  ;;  %s895_s0 = inlined_call_operand.hbm [shape: f32[8,64], index: 0, kind: input, shape index: {}]   ;;  %s896_s1 = inlined_call_operand.hbm [shape: bf16[64,128], index: 1, kind: input, shape index: {}]   ;;  %s897_s2 = inlined_call_operand.hbm [shape: bf16[128,128], index: 2, kind: input, shape index: {}]   ;;  %s898_s3 = inlined_call_operand.hbm [shape: bf16[128,128], index: 3, kind: input, shape index: {}]   ;;  %s899_s4 = inlined_call_operand.hbm [shape: f32[8,128], index: 4, kind: input, shape index: {}]   ;;  %s900_s5 = inlined_call_operand.vmem [shape: f32[1,128], index: 5, kind: input, shape index: {}]   ;;  %s901_s6 = inlined_call_operand.hbm [shape: f32[8,128], index: 6, kind: output, shape index: {}]  }
   0x1   :  { %12 = vsyncpa [#allocation6], 0 }
   0x2   :  { %13 = vsyncpa [#allocation9], 0  ;;  %s30_s23 = sshll.u32 %s896_s1, 4  ;;  %s31_s23 = int_to_ptr.hbm [resolvable:$true] %s30_s23 }
   0x3   :  { %14 = vsyncpa [#allocation4], 0  ;;  %s807_s24 = smov [#allocation5]   ;;  %s56_s28 = sshll.u32 %s898_s3, 4  ;;  %s57_s28 = int_to_ptr.hbm [resolvable:$true] %s56_s28 }
   0x4   :  { %s32_s25 = sshll.u32 %s807_s24, 4  ;;  %s808_s29 = smov 64   ;;  %s33_s25 = int_to_ptr.vmem [resolvable:$true] %s32_s25 }
   0x5   :  { %s809_s30 = smov 4   ;;  %s810_s7 = smov [#allocation8]  }
   0x6   :  { %38 = dma.hbm_to_vmem [thread:$0]  %s31_s23, 512, %s33_s25, [#allocation6], %s808_s29, %s808_s29, %s809_s30  }
   0x7   :  { %s58_s8 = sshll.u32 %s810_s7, 4  ;;  %s20_s11 = sshll.u32 %s895_s0, 4  ;;  %s59_s8 = int_to_ptr.vmem [resolvable:$true] %s58_s8  ;;  %s21_s11 = int_to_ptr.hbm [resolvable:$true] %s20_s11 }
   0x8   :  { %64 = dma.hbm_to_vmem [thread:$0]  %s57_s28, 1024, %s59_s8, [#allocation9], %s808_s29, %s808_s29, %s809_s30  }
   0x9   :  { %s43_s13 = sshll.u32 %s897_s2, 4  ;;  %s811_s14 = smov [#allocation2]   ;;  %s44_s13 = int_to_ptr.hbm [resolvable:$true] %s43_s13 }
   0xa   :  { %s22_s15 = sshll.u32 %s811_s14, 4  ;;  %s812_s3 = smov [#allocation7]   ;;  %s23_s15 = int_to_ptr.vmem [resolvable:$true] %s22_s15 }
   0xb   :  { %25 = dma.hbm_to_vmem [thread:$0]  %s21_s11, 128, %s23_s15, [#allocation3]  }
   0xc   :  { %s45_s16 = sshll.u32 %s812_s3, 4  ;;  %s70_s19 = sshll.u32 %s899_s4, 4  ;;  %s46_s16 = int_to_ptr.vmem [resolvable:$true] %s45_s16  ;;  %s71_s19 = int_to_ptr.hbm [resolvable:$true] %s70_s19 }
   0xd   :  { %51 = dma.hbm_to_vmem [thread:$0]  %s44_s13, 1024, %s46_s16, [#allocation6], %s808_s29, %s808_s29, %s809_s30  }
   0xe   :  { %s813_s0 = smov [#allocation10]  }
   0xf   :  { %s72_s20 = sshll.u32 %s813_s0, 4  ;;  %s73_s20 = int_to_ptr.vmem [resolvable:$true] %s72_s20 }
  0x10   :  { %75 = dma.hbm_to_vmem [thread:$0]  %s71_s19, 128, %s73_s20, [#allocation9]  }
  0x11   :  { %787 = dma.done.wait [#allocation3], 128  }
  0x12   :  { %788 = vsyncadd [#allocation3], 4294967168 }
  0x13   :  { %789 = dma.done.wait [#allocation6], 1536  }
  0x14   :  { %790 = vsyncadd [#allocation6], 4294965760 }
  0x15   :  { %791 = dma.done.wait [#allocation9], 1152  }
  0x16   :  { %792 = vsyncadd [#allocation9], 4294966144  ;;  %v560_v0 = vld [vmem:[#allocation5 + $0x18] sm:$0xff]  ;;  %v559_v1 = vld [vmem:[#allocation5 + $0x10] sm:$0xff]  ;;  %vm138_vm0 = vcmask 523264   ;;  %v814_v11 = vmov 128.0  }
  0x17   :  { %146 = vmatpush.bf16.msra.mxu0 %v560_v0  ;;  %v558_v2 = vld [vmem:[#allocation5 + $0x8] sm:$0xff]  ;;  %v557_v3 = vld [vmem:[#allocation5] sm:$0xff]  ;;  %v103_v4 = vld [vmem:[#allocation2] sm:$0xff]  ;;  %624 = vrcp.f32 %v814_v11  ;;  %v795_v52 = vmov 1065353217   ;;  %v799_v53 = vmov 0  }
  0x18   :  { %v104_v5 = vpack.c.bf16 %v103_v4, %v103_v4  ;;  %v620_v6 = vld [vmem:[#allocation10] ss:$0 sm:$0xff]  ;;  %v568_v12 = vld [vmem:[#allocation7 + $0x38] sm:$0xff]  ;;  %v567_v23 = vld [vmem:[#allocation7 + $0x30] sm:$0xff]  ;;  %s873_s2 = smov 0  }
  0x19   :  { %253 = vmatpush.bf16.msra.mxu1 %v568_v12  ;;  %v566_v24 = vld [vmem:[#allocation7 + $0x28] sm:$0xff]  ;;  %v565_v25 = vld [vmem:[#allocation7 + $0x20] sm:$0xff]  ;;  %v564_v26 = vld [vmem:[#allocation7 + $0x18] sm:$0xff] }
  0x1a   :  { %v563_v27 = vld [vmem:[#allocation7 + $0x10] sm:$0xff]  ;;  %v562_v28 = vld [vmem:[#allocation7 + $0x8] sm:$0xff]  ;;  %v561_v29 = vld [vmem:[#allocation7] sm:$0xff] }
  0x1b   :  { %147 = vmatpush.bf16.msra.mxu0 %v559_v1  ;;  %v621_v39 = vld [vmem:[#allocation10 + $0x1] ss:$0 sm:$0xff]  ;;  %v622_v42 = vld [vmem:[#allocation10 + $0x2] ss:$0 sm:$0xff]  ;;  %v623_v46 = vld [vmem:[#allocation10 + $0x3] ss:$0 sm:$0xff] }
  0x1d   :  { %v625_v13 = vpop.eup %624  ;;  %254 = vmatpush.bf16.msra.mxu1 %v567_v23 }
  0x1e   :  { %v159_v14 = vmul.f32 128.0, %v625_v13  ;;  %vm163_vm1 = vweird.f32 %v625_v13 }
  0x1f   :  { %148 = vmatpush.bf16.msra.mxu0 %v558_v2 }
  0x20   :  { %v160_v15 = vsub.f32 1.0, %v159_v14 }
  0x21   :  { %255 = vmatpush.bf16.msra.mxu1 %v566_v24 }
  0x22   :  { %v161_v16 = vmul.f32 %v625_v13, %v160_v15 }
  0x23   :  { %149 = vmatpush.bf16.msra.mxu0 %v557_v3 }
  0x24   :  { %v162_v17 = vadd.f32 %v625_v13, %v161_v16 }
  0x25   :  { %256 = vmatpush.bf16.msra.mxu1 %v565_v25 }
  0x26   :  { %491 = vmatmul.msk.bf16.vlgmr.msra.gmra.mxu0 %vm138_vm0, %v104_v5  ;;  %v164_v18 = vsel %vm163_vm1, %v625_v13, %v162_v17 }
  0x29   :  { %257 = vmatpush.bf16.msra.mxu1 %v564_v26 }
  0x2d   :  { %258 = vmatpush.bf16.msra.mxu1 %v563_v27 }
  0x31   :  { %259 = vmatpush.bf16.msra.mxu1 %v562_v28 }
  0x35   :  { %260 = vmatpush.bf16.msra.mxu1 %v561_v29 }
  0xa3   :  { %v151_v7 = vpop.f32.mrf.mxu0 }
  0xa4   :  { %v152_v8 = vadd.f32 %v620_v6, %v151_v7 }
  0xa6   :  { %v155_v9 = vmax.f32 %v152_v8, 0.0 }
  0xa8   :  { %156 = vadd.xlane.f32.xlu0 %v155_v9 }
  0xab   :  { %v153_v10 = vpop.f32.mrf.mxu0 }
 0x11b   :  { %v157_v19 = vpop.xlane.xlu0 %156 }
 0x11c   :  { %v165_v20 = vmul.f32 %v164_v18, %v157_v19 }
 0x11e   :  { %v166_v21 = vsub.f32 %v155_v9, %v165_v20 }
 0x120   :  { %v167_v22 = vmul.f32 %v166_v21, %v166_v21 }
 0x122   :  { %168 = vadd.xlane.f32.xlu0 %v167_v22 }
 0x195   :  { %v169_v30 = vpop.xlane.xlu0 %168 }
 0x196   :  { %v170_v31 = vmul.f32 %v169_v30, %v164_v18 }
 0x198   :  { %v171_v32 = vadd.f32 1e-05, %v170_v31 }
 0x19a   :  { %626 = vrsqrt.f32 %v171_v32  ;;  %vm178_vm3 = vweird.f32 %v171_v32 }
 0x1a0   :  { %v627_v33 = vpop.eup %626 }
 0x1a1   :  { %v173_v34 = vmul.f32 %v627_v33, %v171_v32  ;;  %vm179_vm2 = vweird.f32 %v627_v33 }
 0x1a2   :  { %vm180_vm4 = vmor %vm178_vm3, %vm179_vm2 }
 0x1a3   :  { %v174_v35 = vmul.f32 %v627_v33, %v173_v34 }
 0x1a5   :  { %v175_v36 = vmul.f32 0.5, %v174_v35 }
 0x1a7   :  { %v176_v37 = vsub.f32 1.5, %v175_v36 }
 0x1a9   :  { %v177_v38 = vmul.f32 %v627_v33, %v176_v37 }
 0x1ab   :  { %v181_v40 = vsel %vm180_vm4, %v627_v33, %v177_v38 }
 0x1ac   :  { %v182_v41 = vmul.f32 %v181_v40, %v166_v21 }
 0x1ae   :  { %v184_v43 = vmul.f32 %v621_v39, %v182_v41 }
 0x1b0   :  { %v186_v44 = vadd.f32 %v622_v42, %v184_v43 }
 0x1b2   :  { %v187_v45 = vpack.c.bf16 %v186_v44, %v186_v44 }
 0x1b4   :  { %261 = vmatmul.bf16.vlgmr.msra.gmra.mxu1 %v187_v45 }
 0x231   :  { %v262_v47 = vpop.f32.mrf.mxu1 }
 0x232   :  { %v263_v48 = vadd.f32 %v623_v46, %v262_v47 }
 0x234   :  { %628 = vtanh.f32 %v263_v48 }
 0x239   :  { %v264_v49 = vpop.f32.mrf.mxu1 }
 0x23a   :  { %v868_v50 = vpop.eup %628 }
 0x23b   :  { %v871_v51 = vand.u32 2147483647, %v868_v50 }
 0x23c LB: > { %v277_v54 = vadd.s32 %v797_v52, %v801_v53  ;;  %v815_v56 = vmov 0   ;;  %s274_s2 = sadd.s32 1, %s805_s2   ;;  %s805_s2 = sphi %s873_s2, %s274_s2   ;;  %v801_v53 = vphi %v799_v53, %v302_v53   ;;  %v797_v52 = vphi %v795_v52, %v796_v52  }
 0x23d   : > { %p271_p0 = scmp.ge.s32.totalorder %s274_s2, 31  }
 0x23e   : > { %v278_v55 = vshra.s32 %v277_v54, 1  ;;  %v816_v22 = vmov (%p271_p0), 0   ;;  %v576_v29 = vld [vmem:[#allocation8 + $0x38] sm:$0xff] (%p271_p0)  ;;  %v575_v30 = vld [vmem:[#allocation8 + $0x30] sm:$0xff] (%p271_p0)  ;;  %v574_v31 = vld [vmem:[#allocation8 + $0x28] sm:$0xff] (%p271_p0)  ;;  %s817_s26 = smov (%p271_p0), [#allocation11]  }
 0x23f   :  { %431 = vmatpush.bf16.msra.mxu2 (%p271_p0), %v576_v29  ;;  %v571_v54 = vld [vmem:[#allocation8 + $0x10] sm:$0xff] (%p271_p0)  ;;  %s450_s27 = sshll.u32 (%p271_p0), %s817_s26, 4  ;;  %s452_s30 = sshll.u32 (%p271_p0), %s901_s6, 4  ;;  %s451_s27 = int_to_ptr.vmem [resolvable:$true] %s450_s27  ;;  %s453_s30 = int_to_ptr.hbm [resolvable:$true] %s452_s30 }
 0x240   : > { %vm279_vm5 = vcmp.lt.s32.totalorder %v871_v51, %v278_v55 }
 0x241   : > { %v280_v57 = vsel %vm279_vm5, 1, %v815_v56  ;;  %v569_v56 = vld [vmem:[#allocation8] sm:$0xff] (%p271_p0) }
 0x242   : > { %v282_v58 = vshrl.u32 %v280_v57, 16  ;;  %v281_v60 = vand.u32 65535, %v280_v57 }
 0x243   :  { %432 = vmatpush.bf16.msra.mxu2 (%p271_p0), %v575_v30 }
 0x244   : > { %v284_v59 = vcvt.s32.f32 %v282_v58  ;;  %v283_v61 = vcvt.s32.f32 %v281_v60 }
 0x246   : > { %287 = vadd.xlane.f32.xlu0 %v284_v59 }
 0x247   :  { %433 = vmatpush.bf16.msra.mxu2 (%p271_p0), %v574_v31 }
 0x24e   : > { %285 = vadd.xlane.f32.xlu0 %v283_v61 }
 0x2b9   : > { %v288_v62 = vpop.xlane.xlu0 %287 }
 0x2ba   : > { %v290_v63 = vcvt.f32.s32 %v288_v62  ;;  %v358_v62 = vsub.f32 (%p271_p0), 0.0, %v868_v50 }
 0x2bc   : > { %v291_v1 = vshll.u32 %v290_v63, 16 }
 0x2c1   : > { %v286_v0 = vpop.xlane.xlu0 %285 }
 0x2c2   : > { %v289_v2 = vcvt.f32.s32 %v286_v0 }
 0x2c4   : > { %v292_v3 = vadd.s32 %v291_v1, %v289_v2 }
 0x2c6   : > { %v293_v4 = vrot.slane %v292_v3, 4 }
 0x2c8   : > { %v294_v5 = vadd.s32 %v293_v4, %v292_v3 }
 0x2ca   : > { %v295_v6 = vrot.slane %v294_v5, 2 }
 0x2cc   : > { %v296_v7 = vadd.s32 %v295_v6, %v294_v5  ;;  %v630_v6 = vld [vmem:[%s900_s5] ss:$0 sm:$0xff] (%p271_p0) }
 0x2ce   : > { %v297_v8 = vrot.slane %v296_v7, 1 }
 0x2d0   : > { %v298_v9 = vadd.s32 %v297_v8, %v296_v7 }
 0x2d2   : > { %577 = vpush %v298_v9 }
 0x303   : > { %s578_s4 = spop %577  ;;  %273 = sbr.rel (!%p271_p0) target bundleno = 572 (0x23c), region = 71 }
 0x304   : > { %v300_v10 = vstv %s578_s4 }
 0x305   : > { %vm301_vm6 = vcmp.ge.s32.totalorder %v300_v10, 512 }
 0x306   : > { %v302_v53 = vsel %vm301_vm6, %v801_v53, %v278_v55   ;;  %v303_v11 = vsel %vm301_vm6, %v278_v55, %v797_v52   ;;  %v570_v55 = vld [vmem:[#allocation8 + $0x8] sm:$0xff] (%p271_p0) }
 0x307   : > { %v796_v52 = vmov %v303_v11   ;;  %v524_v12 = vadd.s32 (%p271_p0), 4294967295, %v303_v11  ;;  %v572_v53 = vld [vmem:[#allocation8 + $0x18] sm:$0xff] (%p271_p0) }
 0x308   :  { %v573_v52 = vld [vmem:[#allocation8 + $0x20] sm:$0xff] }
 0x309   :  { %vm305_vm7 = vcmp.le.s32.totalorder %v871_v51, %v524_v12  ;;  %434 = vmatpush.bf16.msra.mxu2 %v573_v52 }
 0x30a   :  { %v306_v13 = vsel %vm305_vm7, %v871_v51, -inf }
 0x30b   :  { %307 = vmax.xlane.f32.xlu0 %v306_v13 }
 0x30d   :  { %435 = vmatpush.bf16.msra.mxu2 %v572_v53 }
 0x311   :  { %436 = vmatpush.bf16.msra.mxu2 %v571_v54 }
 0x315   :  { %437 = vmatpush.bf16.msra.mxu2 %v570_v55 }
 0x319   :  { %438 = vmatpush.bf16.msra.mxu2 %v569_v56 }
 0x37e   :  { %v308_v14 = vpop.xlane.xlu0 %307 }
 0x37f   :  { %v309_v15 = vrot.slane %v308_v14, 4 }
 0x381   :  { %v310_v16 = vmax.f32 %v308_v14, %v309_v15 }
 0x383   :  { %v311_v17 = vrot.slane %v310_v16, 2 }
 0x385   :  { %v312_v18 = vmax.f32 %v310_v16, %v311_v17 }
 0x387   :  { %v313_v19 = vrot.slane %v312_v18, 1 }
 0x389   :  { %v314_v20 = vmax.f32 %v312_v18, %v313_v19 }
 0x38b   :  { %579 = vpush %v314_v20 }
 0x3bc   :  { %s580_s21 = spop %579 }
 0x3bd   :  { %v316_v21 = vstv %s580_s21 }
 0x3be   :  { %vm317_vm8 = vcmp.le.f32.partialorder %v871_v51, %v316_v21  ;;  %vm339_vm9 = vcmp.gt.f32.partialorder %v871_v51, %v316_v21 }
 0x3bf   :  { %v318_v23 = vsel %vm317_vm8, 1, %v816_v22  ;;  %v340_v28 = vsel %vm339_vm9, %v871_v51, inf }
 0x3c0   :  { %v320_v24 = vshrl.u32 %v318_v23, 16  ;;  %v319_v25 = vand.u32 65535, %v318_v23 }
 0x3c2   :  { %v322_v26 = vcvt.s32.f32 %v320_v24  ;;  %v321_v27 = vcvt.s32.f32 %v319_v25 }
 0x3c4   :  { %325 = vadd.xlane.f32.xlu0 %v322_v26  ;;  %323 = vadd.xlane.f32.xlu1 %v321_v27 }
 0x3cc   :  { %341 = vmin.xlane.f32.xlu1 %v340_v28 }
 0x437   :  { %v326_v32 = vpop.xlane.xlu0 %325  ;;  %v324_v33 = vpop.xlane.xlu1 %323 }
 0x438   :  { %v328_v34 = vcvt.f32.s32 %v326_v32  ;;  %v327_v36 = vcvt.f32.s32 %v324_v33 }
 0x43a   :  { %v329_v35 = vshll.u32 %v328_v34, 16 }
 0x43c   :  { %v330_v37 = vadd.s32 %v329_v35, %v327_v36 }
 0x43e   :  { %v331_v38 = vrot.slane %v330_v37, 4 }
 0x43f   :  { %v342_v39 = vpop.xlane.xlu1 %341 }
 0x440   :  { %v332_v40 = vadd.s32 %v331_v38, %v330_v37  ;;  %v343_v41 = vrot.slane %v342_v39, 4 }
 0x442   :  { %v344_v42 = vmin.f32 %v342_v39, %v343_v41  ;;  %v333_v43 = vrot.slane %v332_v40, 2 }
 0x444   :  { %v345_v44 = vrot.slane %v344_v42, 2  ;;  %v334_v45 = vadd.s32 %v333_v43, %v332_v40 }
 0x446   :  { %v346_v46 = vmin.f32 %v344_v42, %v345_v44  ;;  %v335_v47 = vrot.slane %v334_v45, 1 }
 0x448   :  { %v336_v48 = vadd.s32 %v335_v47, %v334_v45  ;;  %v347_v49 = vrot.slane %v346_v46, 1 }
 0x44a   :  { %581 = vpush %v336_v48  ;;  %v348_v51 = vmin.f32 %v346_v46, %v347_v49 }
 0x44c   :  { %583 = vpush %v348_v51 }
 0x47b   :  { %s582_s22 = spop %581 }
 0x47c   :  { %v338_v57 = vstv %s582_s22 }
 0x47d   :  { %vm351_vm10 = vcmp.ge.s32.totalorder %v338_v57, 513  ;;  %s584_s23 = spop %583 }
 0x47e   :  { %v350_v58 = vstv %s584_s23 }
 0x47f   :  { %v352_v59 = vsel %vm351_vm10, %v316_v21, %v350_v58 }
 0x480   :  { %v353_v60 = vsub.f32 %v352_v59, %v316_v21 }
 0x482   :  { %v354_v61 = vmul.f32 0.5, %v353_v60 }
 0x484   :  { %v355_v63 = vadd.f32 %v354_v61, %v316_v21 }
 0x486   :  { %v356_v0 = vsub.f32 %v868_v50, %v355_v63  ;;  %v359_v1 = vsub.f32 %v358_v62, %v355_v63 }
 0x488   :  { %v357_v2 = vmax.f32 %v356_v0, 0.0  ;;  %v360_v3 = vmax.f32 %v359_v1, 0.0 }
 0x48a   :  { %v361_v4 = vsub.f32 %v357_v2, %v360_v3 }
 0x48c   :  { %v362_v5 = vpack.c.bf16 %v361_v4, %v361_v4 }
 0x48e   :  { %439 = vmatmul.bf16.vlgmr.msra.gmra.mxu2 %v362_v5 }
 0x511   :  { %v440_v7 = vpop.f32.mrf.mxu2 }
 0x512   :  { %v441_v8 = vadd.f32 %v630_v6, %v440_v7 }
 0x514   :  { %444 = vst [vmem:[#allocation11] sm:$0xff] %v441_v8 }
 0x515   :  { %455 = dma.vmem_to_hbm [thread:$0]  %s451_s27, 128, %s453_s30, [#allocation4]  }
 0x519   :  { %v442_v50 = vpop.f32.mrf.mxu2 }
 0x51a   :  { %793 = dma.done.wait [#allocation4], 128  }
 0x51b   :  { %794 = vsyncadd [#allocation4], 4294967168 }
 0x51c   :  { %460 = vsyncpa [#allocation3], 1 }
 0x51d   :  { %461 = vsyncpa [#allocation6], 1 }
 0x51e   :  { %462 = vsyncpa [#allocation9], 1 }
 0x51f   :  { %463 = vsyncpa [#allocation4], 1 }

</bundles_post_ra>
